<compile_context>
chip_gen: v5e
topology: v5e:2x2
jax: 0.10.0
libtpu: 0.0.40
codegen_flags: <defaults>
</compile_context>

<pallas_src>
import functools

import jax
import jax.numpy as jnp
from jax import lax
from jax.experimental import pallas as pl
from jax.experimental.pallas import tpu as pltpu


def _eqln_kernel(w_ref, x_ref, o_ref, *, hidden_dim, eps):
    # w_ref: (1, H).  x_ref / o_ref: (TB, 3*H) — dense batch rows; lanes hold
    # the [coord0 | coord1 | coord2] channel slabs of width H each.
    H = hidden_dim

    # Per-slab ref loads (ref slicing is free; avoids materializing the whole
    # (TB, 3H) block in f32).
    x0 = x_ref[:, 0 * H:1 * H].astype(jnp.float32)          # (TB, H) coord-0 slab
    x1 = x_ref[:, 1 * H:2 * H].astype(jnp.float32)          # (TB, H) coord-1 slab
    x2 = x_ref[:, 2 * H:3 * H].astype(jnp.float32)          # (TB, H) coord-2 slab

    # Center each coordinate over its H channels (lane-axis mean per row).
    xc0 = x0 - jnp.mean(x0, axis=1, keepdims=True)
    xc1 = x1 - jnp.mean(x1, axis=1, keepdims=True)
    xc2 = x2 - jnp.mean(x2, axis=1, keepdims=True)

    # Mean over channels of the squared vector norm; the cross-coordinate sum
    # is three VPU multiply-adds on dense (TB, H) slabs (no XLU sublane work).
    sq_norm = xc0 * xc0 + xc1 * xc1 + xc2 * xc2             # (TB, H)
    mean_norm = jnp.mean(sq_norm, axis=1, keepdims=True)    # (TB, 1)

    inv = lax.rsqrt(mean_norm + eps)                        # (TB, 1)  EUP rsqrt
    scale = inv * w_ref[...].astype(jnp.float32)            # (TB, H)

    dt = o_ref.dtype
    o_ref[:, 0 * H:1 * H] = (xc0 * scale).astype(dt)
    o_ref[:, 1 * H:2 * H] = (xc1 * scale).astype(dt)
    o_ref[:, 2 * H:3 * H] = (xc2 * scale).astype(dt)


def _choose_batch_tile(B, H, itemsize):
    """Rows per grid step.

    Multiple of the dtype's native sublane tile, sized so each block's f32
    working set is ~4 MiB, and capped so batches >= 32 keep >= ~4 grid steps
    (minimum 2).
    """
    sub = max(8, 32 // itemsize)                 # f32 -> 8, bf16 -> 16, int8/fp8 -> 32
    lanes = pl.cdiv(3 * H, 128) * 128            # lane-padded row width
    row_f32_bytes = lanes * 4                    # size by the f32 compute footprint
    target = 4 * 1024 * 1024                     # ~4 MiB blocks (v6e/v7x sweet spot)
    tb = max(sub, (int(target // row_f32_bytes) // sub) * sub)
    if B >= 32:
        # The "parallel" batch axis feeds both v7x TensorCores and the DMA
        # pipeline: keep at least ~4 grid steps (never fewer than 2).
        tb = min(tb, max(sub, (B // 4) // sub * sub))
    # Never request a block taller than the (sublane-padded) batch itself.
    tb = min(tb, pl.cdiv(B, sub) * sub)
    return tb


def equivariant_layer_norm(field, affine_weight, eps=1e-5):
    """field: [B, 3, H], affine_weight: [H] -> [B, 3, H] (matches the PyTorch module)."""
    B, C, H = field.shape
    assert C == 3, "expected 3-D vector field in [B, 3, H] layout"
    dtype = field.dtype
    itemsize = jnp.dtype(dtype).itemsize

    # Free reshapes (contiguous dims): no HBM copies here or after the call.
    x = field.reshape(B, C * H)
    w2d = affine_weight.reshape(1, H)

    tb = _choose_batch_tile(B, H, itemsize)
    num_steps = pl.cdiv(B, tb)                   # last block may be ragged — no pad pass

    if num_steps >= 3:
        field_in_spec = pl.BlockSpec((tb, C * H), lambda b: (b, 0),
                                     pipeline_mode=pl.Buffered(3))
    else:
        field_in_spec = pl.BlockSpec((tb, C * H), lambda b: (b, 0))

    kernel = functools.partial(_eqln_kernel, hidden_dim=H, eps=eps)

    cost = pl.CostEstimate(
        flops=10 * B * C * H,
        transcendentals=B,
        bytes_accessed=2 * B * C * H * itemsize + H * itemsize,
    )

    out = pl.pallas_call(
        kernel,
        out_shape=jax.ShapeDtypeStruct((B, C * H), dtype),
        grid_spec=pltpu.PrefetchScalarGridSpec(
            num_scalar_prefetch=0,
            grid=(num_steps,),
            in_specs=[
                pl.BlockSpec((1, H), lambda b: (0, 0)),      # shared affine weight
                field_in_spec,                               # TB batch rows of the field
            ],
            out_specs=pl.BlockSpec((tb, C * H), lambda b: (b, 0)),
        ),
        compiler_params=pltpu.CompilerParams(
            dimension_semantics=("parallel",),
            # Above v5e's 16 MiB / v6e-v7x's 32 MiB default scoped limits (blocks
            # here use ~25-30 MiB incl. 3-deep input + 2-deep output buffers and
            # f32 temps), and comfortably under v7x's 64 MiB physical VMEM.
            vmem_limit_bytes=40 * 1024 * 1024,
        ),
        cost_estimate=cost,
    )(w2d, x)

    return out.reshape(B, C, H)


def _reference(field, affine_weight, eps=1e-5):
    # Pure-JAX reimplementation of the PyTorch forward, for verification.
    f = jnp.transpose(field, (0, 2, 1))                      # [B, H, 3]
    f = f - jnp.mean(f, axis=1, keepdims=True)
    n = jnp.mean(jnp.sum(f * f, axis=-1), axis=1, keepdims=True)
    scale = (n + eps) ** -0.5 * affine_weight                # [B, H]
    f = f * scale[:, :, None]
    return jnp.transpose(f, (0, 2, 1))                       # [B, 3, H]


if __name__ == "__main__":
    key = jax.random.PRNGKey(0)
    k0, k1, k2, k3 = jax.random.split(key, 4)

    # Case 1: small module-consistent shape (batch=2, hidden_dim=32); affine
    # weight is ones, matching nn.Parameter(torch.ones(hidden_dim)).
    B, H = 2, 32
    field = jax.random.normal(k0, (B, 3, H), dtype=jnp.float32)
    w = jnp.ones((H,), dtype=jnp.float32)
    out = jax.block_until_ready(equivariant_layer_norm(field, w))
    ref = _reference(field, w)
    assert out.shape == (B, 3, H)
    assert jnp.allclose(out, ref, atol=2e-5, rtol=2e-5), "mismatch (case 1)"

    # Case 2: ragged final block (B % TB != 0), H not a multiple of 128,
    # non-trivial affine weight, grid long enough to use Buffered(3).
    B2, H2 = 37, 160
    field2 = jax.random.normal(k1, (B2, 3, H2), dtype=jnp.float32)
    w2 = 1.0 + 0.1 * jax.random.normal(k2, (H2,), dtype=jnp.float32)
    out2 = jax.block_until_ready(equivariant_layer_norm(field2, w2))
    ref2 = _reference(field2, w2)
    assert out2.shape == (B2, 3, H2)
    assert jnp.allclose(out2, ref2, atol=2e-5, rtol=2e-5), "mismatch (case 2, ragged)"

    # Case 3: lane-aligned hidden dim (H % 128 == 0) — aligned slab slices and
    # unmasked full-width stores.
    B3, H3 = 16, 128
    field3 = jax.random.normal(k3, (B3, 3, H3), dtype=jnp.float32)
    w3 = jnp.ones((H3,), dtype=jnp.float32)
    out3 = jax.block_until_ready(equivariant_layer_norm(field3, w3))
    ref3 = _reference(field3, w3)
    assert out3.shape == (B3, 3, H3)
    assert jnp.allclose(out3, ref3, atol=2e-5, rtol=2e-5), "mismatch (case 3, aligned)"

    print("KERNEL_OK")
</pallas_src>

<mosaic_0001>
module attributes {stable_mosaic.version = 11 : i64} {
  func.func @_eqln_kernel(%arg0: i32, %arg1: memref<1x32xf32, #tpu.memory_space<vmem>>, %arg2: memref<8x96xf32, #tpu.memory_space<vmem>>, %arg3: memref<8x96xf32, #tpu.memory_space<vmem>>) attributes {dimension_semantics = [#tpu.dimension_semantics<parallel>], iteration_bounds = array<i64: 1>, scalar_prefetch = 0 : i64, scratch_operands = 0 : i64, tpu.core_type = #tpu.core_type<tc>, window_params = [{pipeline_mode = #tpu.pipeline_mode<synchronous>, transform_indices = @transform_0, window_bounds = array<i64: 1, 32>}, {transform_indices = @transform_1, window_bounds = array<i64: 8, 96>}, {transform_indices = @transform_2, window_bounds = array<i64: 8, 96>}]} {
    %c0 = arith.constant 0 : index
    %c0_0 = arith.constant 0 : index
    %0 = vector.load %arg2[%c0, %c0_0] : memref<8x96xf32, #tpu.memory_space<vmem>>, vector<8x32xf32>
    %c0_1 = arith.constant 0 : index
    %c32 = arith.constant 32 : index
    %1 = vector.load %arg2[%c0_1, %c32] : memref<8x96xf32, #tpu.memory_space<vmem>>, vector<8x32xf32>
    %c0_2 = arith.constant 0 : index
    %c64 = arith.constant 64 : index
    %2 = vector.load %arg2[%c0_2, %c64] : memref<8x96xf32, #tpu.memory_space<vmem>>, vector<8x32xf32>
    %cst = arith.constant dense<0.000000e+00> : vector<8xf32>
    %3 = vector.multi_reduction <add>, %0, %cst [1] : vector<8x32xf32> to vector<8xf32>
    %4 = vector.shape_cast %3 : vector<8xf32> to vector<8x1xf32>
    %cst_3 = arith.constant 3.200000e+01 : f32
    %5 = vector.broadcast %cst_3 : f32 to vector<8x1xf32>
    %6 = arith.divf %4, %5 : vector<8x1xf32>
    %7 = vector.broadcast %6 : vector<8x1xf32> to vector<8x32xf32>
    %8 = arith.subf %0, %7 : vector<8x32xf32>
    %cst_4 = arith.constant dense<0.000000e+00> : vector<8xf32>
    %9 = vector.multi_reduction <add>, %1, %cst_4 [1] : vector<8x32xf32> to vector<8xf32>
    %10 = vector.shape_cast %9 : vector<8xf32> to vector<8x1xf32>
    %cst_5 = arith.constant 3.200000e+01 : f32
    %11 = vector.broadcast %cst_5 : f32 to vector<8x1xf32>
    %12 = arith.divf %10, %11 : vector<8x1xf32>
    %13 = vector.broadcast %12 : vector<8x1xf32> to vector<8x32xf32>
    %14 = arith.subf %1, %13 : vector<8x32xf32>
    %cst_6 = arith.constant dense<0.000000e+00> : vector<8xf32>
    %15 = vector.multi_reduction <add>, %2, %cst_6 [1] : vector<8x32xf32> to vector<8xf32>
    %16 = vector.shape_cast %15 : vector<8xf32> to vector<8x1xf32>
    %cst_7 = arith.constant 3.200000e+01 : f32
    %17 = vector.broadcast %cst_7 : f32 to vector<8x1xf32>
    %18 = arith.divf %16, %17 : vector<8x1xf32>
    %19 = vector.broadcast %18 : vector<8x1xf32> to vector<8x32xf32>
    %20 = arith.subf %2, %19 : vector<8x32xf32>
    %21 = arith.mulf %8, %8 : vector<8x32xf32>
    %22 = arith.mulf %14, %14 : vector<8x32xf32>
    %23 = arith.addf %21, %22 : vector<8x32xf32>
    %24 = arith.mulf %20, %20 : vector<8x32xf32>
    %25 = arith.addf %23, %24 : vector<8x32xf32>
    %cst_8 = arith.constant dense<0.000000e+00> : vector<8xf32>
    %26 = vector.multi_reduction <add>, %25, %cst_8 [1] : vector<8x32xf32> to vector<8xf32>
    %27 = vector.shape_cast %26 : vector<8xf32> to vector<8x1xf32>
    %cst_9 = arith.constant 3.200000e+01 : f32
    %28 = vector.broadcast %cst_9 : f32 to vector<8x1xf32>
    %29 = arith.divf %27, %28 : vector<8x1xf32>
    %cst_10 = arith.constant 9.99999974E-6 : f32
    %30 = vector.broadcast %cst_10 : f32 to vector<8x1xf32>
    %31 = arith.addf %29, %30 : vector<8x1xf32>
    %32 = math.rsqrt %31 : vector<8x1xf32>
    %c0_11 = arith.constant 0 : index
    %c0_12 = arith.constant 0 : index
    %33 = vector.load %arg1[%c0_11, %c0_12] : memref<1x32xf32, #tpu.memory_space<vmem>>, vector<1x32xf32>
    %34 = vector.broadcast %32 : vector<8x1xf32> to vector<8x32xf32>
    %35 = vector.broadcast %33 : vector<1x32xf32> to vector<8x32xf32>
    %36 = arith.mulf %34, %35 : vector<8x32xf32>
    %37 = arith.mulf %8, %36 : vector<8x32xf32>
    %c0_13 = arith.constant 0 : index
    %c0_14 = arith.constant 0 : index
    %38 = vector.load %arg3[%c0_13, %c0_14] : memref<8x96xf32, #tpu.memory_space<vmem>>, vector<8x32xf32>
    tpu.vector_store %arg3[%c0_13, %c0_14], %37 {strides = array<i32>} : memref<8x96xf32, #tpu.memory_space<vmem>>, vector<8x32xf32>,
    %39 = arith.mulf %14, %36 : vector<8x32xf32>
    %c0_15 = arith.constant 0 : index
    %c32_16 = arith.constant 32 : index
    %40 = vector.load %arg3[%c0_15, %c32_16] : memref<8x96xf32, #tpu.memory_space<vmem>>, vector<8x32xf32>
    tpu.vector_store %arg3[%c0_15, %c32_16], %39 {strides = array<i32>} : memref<8x96xf32, #tpu.memory_space<vmem>>, vector<8x32xf32>,
    %41 = arith.mulf %20, %36 : vector<8x32xf32>
    %c0_17 = arith.constant 0 : index
    %c64_18 = arith.constant 64 : index
    %42 = vector.load %arg3[%c0_17, %c64_18] : memref<8x96xf32, #tpu.memory_space<vmem>>, vector<8x32xf32>
    tpu.vector_store %arg3[%c0_17, %c64_18], %41 {strides = array<i32>} : memref<8x96xf32, #tpu.memory_space<vmem>>, vector<8x32xf32>,
    return
  }
  func.func @transform_0(%arg0: i32) -> (i32, i32) {
    %c0_i32 = arith.constant 0 : i32
    %c0_i32_0 = arith.constant 0 : i32
    %c0_i32_1 = arith.constant 0 : i32
    return %c0_i32, %c0_i32_0 : i32, i32
  }
  func.func @transform_1(%arg0: i32) -> (i32, i32) {
    %c0_i32 = arith.constant 0 : i32
    %c0_i32_0 = arith.constant 0 : i32
    return %arg0, %c0_i32 : i32, i32
  }
  func.func @transform_2(%arg0: i32) -> (i32, i32) {
    %c0_i32 = arith.constant 0 : i32
    %c0_i32_0 = arith.constant 0 : i32
    return %arg0, %c0_i32 : i32, i32
  }
}

</mosaic_0001>

<bundles_post_ra>
// kernel: tpu_custom_call.1
= control target key start
LH: loop header
LB: loop body
LE: loop exit
PB: predicated region body
PF: predicated region fallthrough
CT: control target
= control target key end

     0   :  { %7 = vsyncpa [#allocation3], 0  ;;  %s279_s0 = inlined_call_operand.hbm [shape: f32[1,32], index: 0, kind: input, shape index: {}]   ;;  %s280_s1 = inlined_call_operand.hbm [shape: f32[2,96], index: 1, kind: input, shape index: {}]   ;;  %s281_s2 = inlined_call_operand.hbm [shape: f32[2,96], index: 2, kind: output, shape index: {}]  }
   0x1   :  { %8 = vsyncpa [#allocation6], 0 }
   0x2   :  { %9 = vsyncpa [#allocation4], 0  ;;  %s15_s11 = sshll.u32 %s279_s0, 4  ;;  %s232_s12 = smov [#allocation2]   ;;  %s16_s11 = int_to_ptr.hbm [resolvable:$true] %s15_s11 }
   0x3   :  { %s17_s13 = sshll.u32 %s232_s12, 4  ;;  %s18_s13 = int_to_ptr.vmem [resolvable:$true] %s17_s13 }
   0x4   :  { %20 = dma.hbm_to_vmem [thread:$0]  %s16_s11, 16, %s18_s13, [#allocation3]  }
   0x5   :  { %24 = vsyncadd [#allocation6], 96  ;;  %s25_s16 = sshll.u32 %s280_s1, 4  ;;  %s233_s17 = smov [#allocation5]   ;;  %s26_s16 = int_to_ptr.hbm [resolvable:$true] %s25_s16 }
   0x6   :  { %s27_s18 = sshll.u32 %s233_s17, 4  ;;  %s234_s19 = smov 32   ;;  %s28_s18 = int_to_ptr.vmem [resolvable:$true] %s27_s18 }
   0x7   :  { %s235_s20 = smov 2  }
   0x8   :  { %33 = dma.hbm_to_vmem [thread:$0]  %s26_s16, 32, %s28_s18, [#allocation6], %s234_s19, %s234_s19, %s235_s20  }
   0x9   :  { %226 = dma.done.wait [#allocation3], 16  }
   0xa   :  { %227 = vsyncadd [#allocation3], 4294967280 }
   0xb   :  { %228 = dma.done.wait [#allocation6], 128  }
   0xc   :  { %229 = vsyncadd [#allocation6], 4294967168  ;;  %v42_v0 = vld [vmem:[#allocation5] sm:$0xff]  ;;  %s236_s0 = smov 96   ;;  %s237_s21 = smov 64   ;;  %vm43_vm0 = vcmask 261120  }
   0xd   :  { %57 = vrot.lane.b32.xlu0 %v42_v0, %s236_s0  ;;  %v44_v1 = vsel %vm43_vm0, %v42_v0, 0.0  ;;  %v238_v6 = vmov 32.0   ;;  %v149_v38 = vld [vmem:[#allocation2] ss:$0 sm:$0xff]  ;;  %vm113_vm5 = vcmask 523520   ;;  %vm119_vm6 = vcmask 785920  }
   0xe   :  { %45 = vadd.xlane.f32.xlu2 %v44_v1  ;;  %150 = vrcp.f32 %v238_v6 }
  0x14   :  { %v151_v7 = vpop.eup %150 }
  0x15   :  { %65 = vrot.lane.b32.xlu0 %v42_v0, %s237_s21  ;;  %v48_v8 = vmul.f32 32.0, %v151_v7  ;;  %vm52_vm1 = vweird.f32 %v151_v7 }
  0x17   :  { %v49_v9 = vsub.f32 1.0, %v48_v8 }
  0x19   :  { %v50_v10 = vmul.f32 %v151_v7, %v49_v9 }
  0x1b   :  { %v51_v11 = vadd.f32 %v151_v7, %v50_v10 }
  0x1d   :  { %v53_v12 = vsel %vm52_vm1, %v151_v7, %v51_v11 }
  0x7f   :  { %v58_v2 = vpop.permute.xlu0 %57 }
  0x80   :  { %v60_v3 = vsel %vm43_vm0, %v58_v2, 0.0 }
  0x81   :  { %61 = vadd.xlane.f32.xlu1 %v60_v3  ;;  %v46_v21 = vpop.xlane.xlu2 %45 }
  0x82   :  { %v54_v22 = vmul.f32 %v53_v12, %v46_v21 }
  0x84   :  { %v55_v23 = vsub.f32 %v42_v0, %v54_v22 }
  0x86   :  { %v73_v24 = vmul.f32 %v55_v23, %v55_v23 }
  0x87   :  { %v66_v4 = vpop.permute.xlu0 %65 }
  0x88   :  { %v68_v5 = vsel %vm43_vm0, %v66_v4, 0.0 }
  0x89   :  { %69 = vadd.xlane.f32.xlu1 %v68_v5 }
  0xf4   :  { %v62_v13 = vpop.xlane.xlu1 %61 }
  0xf5   :  { %v63_v14 = vmul.f32 %v62_v13, %v53_v12 }
  0xf7   :  { %v64_v15 = vsub.f32 %v42_v0, %v63_v14 }
  0xf9   :  { %v74_v16 = vmul.f32 %v64_v15, %v64_v15 }
  0xfb   :  { %76 = vrot.lane.b32.xlu2 %v74_v16, %s236_s0 }
  0xfc   :  { %v70_v17 = vpop.xlane.xlu1 %69 }
  0xfd   :  { %v71_v18 = vmul.f32 %v70_v17, %v53_v12 }
  0xff   :  { %v72_v19 = vsub.f32 %v42_v0, %v71_v18 }
 0x101   :  { %v80_v20 = vmul.f32 %v72_v19, %v72_v19 }
 0x103   :  { %82 = vrot.lane.b32.xlu0 %v80_v20, %s237_s21 }
 0x155   :  { %v77_v25 = vpop.permute.xlu2 %76 }
 0x156   :  { %v79_v26 = vadd.f32 %v77_v25, %v73_v24 }
 0x175   :  { %v83_v27 = vpop.permute.xlu0 %82 }
 0x176   :  { %v85_v28 = vadd.f32 %v83_v27, %v79_v26 }
 0x178   :  { %v86_v29 = vsel %vm43_vm0, %v85_v28, 0.0 }
 0x179   :  { %87 = vadd.xlane.f32.xlu1 %v86_v29 }
 0x1ec   :  { %v88_v30 = vpop.xlane.xlu1 %87 }
 0x1ed   :  { %v89_v31 = vmul.f32 %v88_v30, %v53_v12 }
 0x1ef   :  { %v90_v32 = vadd.f32 1e-05, %v89_v31 }
 0x1f1   :  { %152 = vrsqrt.f32 %v90_v32  ;;  %vm97_vm3 = vweird.f32 %v90_v32 }
 0x1f7   :  { %v153_v33 = vpop.eup %152 }
 0x1f8   :  { %v92_v34 = vmul.f32 %v153_v33, %v90_v32  ;;  %vm98_vm2 = vweird.f32 %v153_v33 }
 0x1f9   :  { %vm99_vm4 = vmor %vm97_vm3, %vm98_vm2 }
 0x1fa   :  { %v93_v35 = vmul.f32 %v153_v33, %v92_v34 }
 0x1fc   :  { %v94_v36 = vmul.f32 0.5, %v93_v35 }
 0x1fe   :  { %v95_v37 = vsub.f32 1.5, %v94_v36 }
 0x200   :  { %v96_v39 = vmul.f32 %v153_v33, %v95_v37 }
 0x202   :  { %v100_v40 = vsel %vm99_vm4, %v153_v33, %v96_v39 }
 0x203   :  { %v105_v41 = vmul.f32 %v149_v38, %v100_v40 }
 0x205   :  { %115 = vrot.lane.b32.xlu1 %v105_v41, %s237_s21  ;;  %v106_v42 = vmul.f32 %v105_v41, %v55_v23  ;;  %109 = vrot.lane.b32.xlu0 %v105_v41, %s234_s19 }
 0x207   :  { %107 = vst.msk [vmem:[#allocation7] sm:$0xff] %vm43_vm0, %v106_v42 }
 0x277   :  { %v116_v43 = vpop.permute.xlu1 %115  ;;  %v110_v44 = vpop.permute.xlu0 %109 }
 0x278   :  { %v118_v45 = vmul.f32 %v116_v43, %v72_v19  ;;  %v112_v46 = vmul.f32 %v110_v44, %v64_v15 }
 0x27a   :  { %114 = vst.msk [vmem:[#allocation7] sm:$0xff] %vm113_vm5, %v112_v46 }
 0x27b   :  { %120 = vst.msk [vmem:[#allocation7] sm:$0xff] %vm119_vm6, %v118_v45 }
 0x27c   :  { %124 = vsyncadd [#allocation4], 96  ;;  %s127_s23 = sshll.u32 %s281_s2, 4  ;;  %s239_s24 = smov [#allocation7]   ;;  %s128_s23 = int_to_ptr.hbm [resolvable:$true] %s127_s23 }
 0x27d   :  { %s125_s25 = sshll.u32 %s239_s24, 4  ;;  %s126_s25 = int_to_ptr.vmem [resolvable:$true] %s125_s25 }
 0x27e   :  { %133 = dma.vmem_to_hbm [thread:$0]  %s126_s25, 32, %s128_s23, [#allocation4], %s234_s19, %s234_s19, %s235_s20  }
 0x27f   :  { %230 = dma.done.wait [#allocation4], 128  }
 0x280   :  { %231 = vsyncadd [#allocation4], 4294967168 }
 0x281   :  { %138 = vsyncpa [#allocation3], 1 }
 0x282   :  { %139 = vsyncpa [#allocation6], 1 }
 0x283   :  { %140 = vsyncpa [#allocation4], 1 }

</bundles_post_ra>
